<compile_context>
chip_gen: v7x
topology: tpu7x:2x2x1
jax: 0.10.0
libtpu: 0.0.40
codegen_flags: <defaults>
</compile_context>

<pallas_src>
import functools

import jax
import jax.numpy as jnp
from jax.experimental import pallas as pl
from jax.experimental.pallas import tpu as pltpu


def _vq_kernel(x_ref, e_ref, nhalf_esq_ref, zq_ref, idx_ref):
    # x_ref:         (1, C, thw) f32 pixel tile (channels on sublanes, pixels on lanes)
    # e_ref:         (K, C)      f32 codebook, resident across the whole grid
    # nhalf_esq_ref: (K, 1)      f32 precomputed -0.5 * ||e_k||^2
    # zq_ref:        (1, C, thw) f32 quantized output
    # idx_ref:       (1, 1, thw) i32 nearest-neighbor indices (lane-dense)
    x = x_ref[0]                      # (C, thw)
    e = e_ref[...]                    # (K, C)
    K = e.shape[0]

    # argmin_k ||e_k - x_p||^2 == argmax_k (e_k . x_p - 0.5*||e_k||^2).
    # Cross term on the MXU at DEFAULT precision (ranking only needs ordering).
    score = (jnp.dot(e, x, preferred_element_type=jnp.float32)
             + nhalf_esq_ref[...])                                # (K, thw)

    # argmax over K with torch.argmin-style tie-breaking (first index of optimum).
    max_val = jnp.max(score, axis=0, keepdims=True)               # (1, thw)
    k_iota = jax.lax.broadcasted_iota(jnp.int32, score.shape, 0)  # (K, thw)
    idx = jnp.min(jnp.where(score == max_val, k_iota, K),
                  axis=0, keepdims=True)                          # (1, thw) i32

    # zq[:, p] = embedding[idx[p], :] via one-hot matmul contracting K.
    # HIGHEST keeps the gather exact (torch gathers rows bit-exactly).
    onehot = (k_iota == idx).astype(jnp.float32)                  # (K, thw)
    zq = jax.lax.dot_general(
        e, onehot,
        dimension_numbers=(((0,), (0,)), ((), ())),               # e^T @ onehot
        precision=jax.lax.Precision.HIGHEST,
        preferred_element_type=jnp.float32)                       # (C, thw)

    zq_ref[0] = zq.astype(zq_ref.dtype)
    idx_ref[...] = idx[None]                                      # (1, 1, thw)


@functools.lru_cache(maxsize=1)
def _vmem_capacity_bytes():
    try:
        return int(pltpu.get_tpu_info().vmem_capacity_bytes)
    except Exception:
        return 64 * 1024 * 1024        # conservative (v7x-sized) fallback


def _round_up(x, m):
    return -(-x // m) * m


@jax.jit
def vector_quantizer_forward(feather, embedding):
    """feather: (N, C, H, W) float32, embedding: (K, C) float32.

    Returns (decoder_input, zq, nearest_neighbor) with shapes
    (N, C, H, W), (N, C, H, W), (N, 1, H, W).  decoder_input is aliased to zq
    (straight-through forward value); indices are int32 (torch uses int64).
    """
    N, C, H, W = feather.shape
    K, Ce = embedding.shape
    assert Ce == C
    HW = H * W

    # Channels-leading slab; pure reshape (no transpose, no HBM round-trip).
    x3 = feather.reshape(N, C, HW)

    # Hoisted per-tile constant: -0.5 * ||e_k||^2 (tiny (K, 1) array).
    nhalf_esq = -0.5 * jnp.sum(embedding * embedding, axis=1, keepdims=True)

    # ---- generation-aware tile sizing -------------------------------------
    vmem_cap = _vmem_capacity_bytes()
    vmem_limit = min(96 * 1024 * 1024, (3 * vmem_cap) // 4)   # 96 MiB on 128-MiB
                                                              # parts, 48 MiB on v7x
    if HW <= 128:
        thw = HW                       # full (short) spatial axis in one tile
    else:
        # Rough live bytes per pixel column: double-buffered (C,thw) in/out +
        # (1,thw) idx, plus ~5 live (K,thw) f32/i32 temporaries (score, iota,
        # masked-iota, one-hot) and the (C,thw) gather result.
        per_col = 4 * (5 * C + 5 * K + 6)
        budget = (6 * vmem_limit) // 10          # leave headroom under the limit
        fit = max(128, (budget // per_col) // 128 * 128)
        # v7x megacore: keep >= ~4 total "parallel" grid steps at small batch.
        want_tiles = max(1, -(-4 // N))
        even = _round_up(-(-HW // want_tiles), 128)
        thw = max(128, min(fit, even, _round_up(HW, 128)))

    grid = (N, pl.cdiv(HW, thw))       # partial last tile is masked by Pallas

    zq3, idx3 = pl.pallas_call(
        _vq_kernel,
        out_shape=(
            jax.ShapeDtypeStruct((N, C, HW), feather.dtype),
            jax.ShapeDtypeStruct((N, 1, HW), jnp.int32),
        ),
        grid_spec=pltpu.PrefetchScalarGridSpec(
            num_scalar_prefetch=0,
            grid=grid,
            in_specs=[
                pl.BlockSpec((1, C, thw), lambda n, t: (n, 0, t)),  # pixel tile
                pl.BlockSpec((K, C), lambda n, t: (0, 0)),          # codebook
                pl.BlockSpec((K, 1), lambda n, t: (0, 0)),          # -0.5||e||^2
            ],
            out_specs=[
                pl.BlockSpec((1, C, thw), lambda n, t: (n, 0, t)),
                pl.BlockSpec((1, 1, thw), lambda n, t: (n, 0, t)),
            ],
        ),
        compiler_params=pltpu.CompilerParams(
            dimension_semantics=("parallel", "parallel"),
            vmem_limit_bytes=vmem_limit,
        ),
    )(x3, embedding, nhalf_esq)

    zq = zq3.reshape(N, C, H, W)
    nearest_neighbor = idx3.reshape(N, 1, H, W)
    # Forward value of feather + (zq - feather).detach() == zq; alias instead of
    # writing a second full-width output (halves HBM write traffic).
    decoder_input = zq
    return decoder_input, zq, nearest_neighbor


if __name__ == "__main__":
    # Small shapes: batch=2, codebook_dim(C)=4, spatial=16x16, codebook_size=16
    N, C, H, W = 2, 4, 16, 16
    codebook_size = 16

    key = jax.random.PRNGKey(0)
    k_feat, k_emb = jax.random.split(key)

    feather = jax.random.normal(k_feat, (N, C, H, W), dtype=jnp.float32)
    # nn.Embedding weight init: uniform(-1/K, 1/K), shape (K, codebook_dim)
    embedding = jax.random.uniform(
        k_emb, (codebook_size, C), dtype=jnp.float32,
        minval=-1.0 / codebook_size, maxval=1.0 / codebook_size)

    dec, zq, nn_idx = vector_quantizer_forward(feather, embedding)
    jax.block_until_ready((dec, zq, nn_idx))

    # ---- verification against the exact (PyTorch-style) reference ----------
    K = codebook_size
    dist = jnp.sum((embedding.reshape(1, K, C, 1, 1)
                    - feather.reshape(N, 1, C, H, W)) ** 2, axis=2)   # (N,K,H,W)
    nn_ref = jnp.argmin(dist, axis=1)                                 # (N,H,W)
    zq_ref = jnp.transpose(embedding[nn_ref], (0, 3, 1, 2))           # (N,C,H,W)
    dec_ref = feather + (zq_ref - feather)

    assert dec.shape == (N, C, H, W) and zq.shape == (N, C, H, W)
    assert nn_idx.shape == (N, 1, H, W) and nn_idx.dtype == jnp.int32

    idx_k = nn_idx[:, 0]                                              # (N,H,W)
    # 1) kernel indices select a minimal (or near-tied) codeword.  The score
    #    matmul now runs at DEFAULT (bf16 MXU) precision, so allow bf16-level
    #    slack on the distance gap.
    dist_at_k = jnp.take_along_axis(dist, idx_k[:, None], axis=1)[:, 0]
    dist_min = jnp.min(dist, axis=1)
    assert bool(jnp.all(dist_at_k <= dist_min + 5e-2))
    # 2) gathered codewords are exactly the codebook rows the kernel chose.
    zq_gather = jnp.transpose(embedding[idx_k], (0, 3, 1, 2))
    assert bool(jnp.allclose(zq, zq_gather, atol=1e-6))
    # 3) straight-through forward value.
    assert bool(jnp.allclose(dec, feather + (zq - feather), atol=1e-5))
    # 4) wherever there is no near-tie, results match the exact reference.
    agree = (idx_k == nn_ref)[:, None]                                # (N,1,H,W)
    assert bool(jnp.all(jnp.where(agree, jnp.abs(zq - zq_ref), 0.0) <= 1e-6))
    assert bool(jnp.all(jnp.where(agree, jnp.abs(dec - dec_ref), 0.0) <= 1e-5))

    print("KERNEL_OK")
</pallas_src>

<mosaic_0001>
module attributes {stable_mosaic.version = 11 : i64} {
  func.func @_vq_kernel(%arg0: i32, %arg1: i32, %arg2: memref<1x4x128xf32, #tpu.memory_space<vmem>>, %arg3: memref<16x4xf32, #tpu.memory_space<vmem>>, %arg4: memref<16x1xf32, #tpu.memory_space<vmem>>, %arg5: memref<1x4x128xf32, #tpu.memory_space<vmem>>, %arg6: memref<1x1x128xi32, #tpu.memory_space<vmem>>) attributes {dimension_semantics = [#tpu.dimension_semantics<parallel>, #tpu.dimension_semantics<parallel>], iteration_bounds = array<i64: 2, 2>, scalar_prefetch = 0 : i64, scratch_operands = 0 : i64, tpu.core_type = #tpu.core_type<tc>, window_params = [{transform_indices = @transform_0, window_bounds = array<i64: 1, 4, 128>}, {pipeline_mode = #tpu.pipeline_mode<synchronous>, transform_indices = @transform_1, window_bounds = array<i64: 16, 4>}, {pipeline_mode = #tpu.pipeline_mode<synchronous>, transform_indices = @transform_2, window_bounds = array<i64: 16, 1>}, {transform_indices = @transform_3, window_bounds = array<i64: 1, 4, 128>}, {transform_indices = @transform_4, window_bounds = array<i64: 1, 1, 128>}]} {
    %c0 = arith.constant 0 : index
    %c0_0 = arith.constant 0 : index
    %c0_1 = arith.constant 0 : index
    %0 = vector.load %arg2[%c0, %c0_0, %c0_1] : memref<1x4x128xf32, #tpu.memory_space<vmem>>, vector<1x4x128xf32>
    %1 = vector.shape_cast %0 : vector<1x4x128xf32> to vector<4x128xf32>
    %c0_2 = arith.constant 0 : index
    %c0_3 = arith.constant 0 : index
    %2 = vector.load %arg3[%c0_2, %c0_3] : memref<16x4xf32, #tpu.memory_space<vmem>>, vector<16x4xf32>
    %cst = arith.constant dense<0.000000e+00> : vector<16x128xf32>
    %3 = tpu.matmul %2, %1, %cst {dimension_numbers = #tpu.dot_dimension_numbers<[1], [0], [0], [1], [0, 0, 1, 1], [], []>} : vector<16x4xf32>, vector<4x128xf32>, vector<16x128xf32> -> vector<16x128xf32>
    %c0_4 = arith.constant 0 : index
    %c0_5 = arith.constant 0 : index
    %4 = vector.load %arg4[%c0_4, %c0_5] : memref<16x1xf32, #tpu.memory_space<vmem>>, vector<16x1xf32>
    %5 = vector.broadcast %4 : vector<16x1xf32> to vector<16x128xf32>
    %6 = arith.addf %3, %5 : vector<16x128xf32>
    %cst_6 = arith.constant dense<0xFF800000> : vector<128xf32>
    %7 = vector.multi_reduction <maximumf>, %6, %cst_6 [0] : vector<16x128xf32> to vector<128xf32>
    %8 = vector.shape_cast %7 : vector<128xf32> to vector<1x128xf32>
    %9 = tpu.iota {dimensions = array<i32: 0>} : vector<16x128xi32>
    %10 = vector.broadcast %8 : vector<1x128xf32> to vector<16x128xf32>
    %11 = arith.cmpf oeq, %6, %10 : vector<16x128xf32>
    %c16_i32 = arith.constant 16 : i32
    %12 = vector.broadcast %c16_i32 : i32 to vector<16x128xi32>
    %13 = arith.select %11, %9, %12 : vector<16x128xi1>, vector<16x128xi32>
    %cst_7 = arith.constant dense<2147483647> : vector<128xi32>
    %14 = vector.multi_reduction <minsi>, %13, %cst_7 [0] : vector<16x128xi32> to vector<128xi32>
    %15 = vector.shape_cast %14 : vector<128xi32> to vector<1x128xi32>
    %16 = vector.broadcast %15 : vector<1x128xi32> to vector<16x128xi32>
    %17 = arith.cmpi eq, %9, %16 : vector<16x128xi32>
    %18 = arith.extui %17 : vector<16x128xi1> to vector<16x128xi32>
    %19 = arith.sitofp %18 : vector<16x128xi32> to vector<16x128xf32>
    %cst_8 = arith.constant dense<0.000000e+00> : vector<4x128xf32>
    %20 = tpu.matmul %2, %19, %cst_8 {dimension_numbers = #tpu.dot_dimension_numbers<[0], [0], [1], [1], [0, 1, 1, 1], [], []>, precision = #tpu.contract_precision<fp32>} : vector<16x4xf32>, vector<16x128xf32>, vector<4x128xf32> -> vector<4x128xf32>
    %c0_9 = arith.constant 0 : index
    %c0_10 = arith.constant 0 : index
    %c0_11 = arith.constant 0 : index
    %21 = vector.load %arg5[%c0_9, %c0_10, %c0_11] : memref<1x4x128xf32, #tpu.memory_space<vmem>>, vector<1x4x128xf32>
    %22 = vector.shape_cast %21 : vector<1x4x128xf32> to vector<4x128xf32>
    %23 = vector.shape_cast %20 : vector<4x128xf32> to vector<1x4x128xf32>
    tpu.vector_store %arg5[%c0_9, %c0_10, %c0_11], %23 {strides = array<i32>} : memref<1x4x128xf32, #tpu.memory_space<vmem>>, vector<1x4x128xf32>,
    %24 = vector.shape_cast %15 : vector<1x128xi32> to vector<1x1x128xi32>
    %c0_12 = arith.constant 0 : index
    %c0_13 = arith.constant 0 : index
    %c0_14 = arith.constant 0 : index
    %25 = vector.load %arg6[%c0_12, %c0_13, %c0_14] : memref<1x1x128xi32, #tpu.memory_space<vmem>>, vector<1x1x128xi32>
    tpu.vector_store %arg6[%c0_12, %c0_13, %c0_14], %24 {strides = array<i32>} : memref<1x1x128xi32, #tpu.memory_space<vmem>>, vector<1x1x128xi32>,
    return
  }
  func.func @transform_0(%arg0: i32, %arg1: i32) -> (i32, i32, i32) {
    %c0_i32 = arith.constant 0 : i32
    %c0_i32_0 = arith.constant 0 : i32
    return %arg0, %c0_i32, %arg1 : i32, i32, i32
  }
  func.func @transform_1(%arg0: i32, %arg1: i32) -> (i32, i32) {
    %c0_i32 = arith.constant 0 : i32
    %c0_i32_0 = arith.constant 0 : i32
    %c0_i32_1 = arith.constant 0 : i32
    return %c0_i32, %c0_i32_0 : i32, i32
  }
  func.func @transform_2(%arg0: i32, %arg1: i32) -> (i32, i32) {
    %c0_i32 = arith.constant 0 : i32
    %c0_i32_0 = arith.constant 0 : i32
    %c0_i32_1 = arith.constant 0 : i32
    return %c0_i32, %c0_i32_0 : i32, i32
  }
  func.func @transform_3(%arg0: i32, %arg1: i32) -> (i32, i32, i32) {
    %c0_i32 = arith.constant 0 : i32
    %c0_i32_0 = arith.constant 0 : i32
    return %arg0, %c0_i32, %arg1 : i32, i32, i32
  }
  func.func @transform_4(%arg0: i32, %arg1: i32) -> (i32, i32, i32) {
    %c0_i32 = arith.constant 0 : i32
    %c0_i32_0 = arith.constant 0 : i32
    return %arg0, %c0_i32, %arg1 : i32, i32, i32
  }
}

</mosaic_0001>

<bundles_post_ra>
// kernel: vector_quantizer_forward.1
= control target key start
LH: loop header
LB: loop body
LE: loop exit
PB: predicated region body
PF: predicated region fallthrough
CT: control target
= control target key end

     0   :  { %s1238_s15 = smov 0   ;;  %s1240_s16 = smov 0   ;;  %s1344_s0 = inlined_call_operand.vmem [shape: f32[2,4,256], index: 0, kind: input, shape index: {}]   ;;  %s1345_s1 = inlined_call_operand.vmem [shape: f32[16,4], index: 1, kind: input, shape index: {}]   ;;  %s1346_s2 = inlined_call_operand.vmem [shape: f32[16,1], index: 2, kind: input, shape index: {}]   ;;  %s1347_s3 = inlined_call_operand.vmem [shape: f32[2,4,256], index: 3, kind: output, shape index: {0}]   ;;  %s1348_s4 = inlined_call_operand.vmem [shape: s32[2,1,256], index: 4, kind: output, shape index: {1}]  }
   0x1   :  { %s1242_s17 = smov 0   ;;  %s1244_s18 = smov 0  }
   0x2   :  { %s1246_s19 = smov 0  }
   0x3 LB: > { %s24_s20 = sadd.s32 1, %s1198_s17  ;;  %s27_s21 = sadd.s32 1, %s1202_s18  ;;  %s1206_s19 = sphi %s1246_s19, %s15_s19   ;;  %s1202_s18 = sphi %s1244_s18, %s1354_s18   ;;  %s1198_s17 = sphi %s1242_s17, %s1353_s17   ;;  %s1194_s16 = sphi %s1240_s16, %s1352_s16   ;;  %s1190_s15 = sphi %s1238_s15, %s1351_s15  }
   0x4   : > { %p25_p0 = scmp.ge.s32.totalorder %s24_s20, 2  ;;  %p1008_p1 = scmp.ge.s32.totalorder %s1206_s19, 1 }
   0x5   : > { %p186_p2 = scmp.lt.s32.totalorder %s1206_s19, 5 }
   0x6   : > { %s1356_s20 = smov (%p25_p0, %s24_s20), 0  ;;  %s1358_s21 = smov (!%p25_p0, %s27_s21), %s1202_s18 }
   0x7   : > { %p187_p3 = pnand %p1008_p1, %p186_p2  ;;  %p29_p4 = scmp.ge.s32.totalorder %s1358_s21, 2 }
   0x8   : > { %p225_p5 = scmp.lt.s32.totalorder (!%p187_p3), %s1194_s16, 1  ;;  %p227_p6 = scmp.lt.s32.totalorder (!%p187_p3), %s1190_s15, 1  ;;  %v249_v0 = vld [vmem:[%s1345_s1] sm:$0xff] (!%p187_p3)  ;;  %vm263_vm0 = vcmask (!%p187_p3), 31744   ;;  %v1208_v2 = vmov (!%p187_p3), 0   ;;  %v250_v3 = vld [vmem:[%s1345_s1 + $0x8] sm:$0xff] (!%p187_p3)  ;;  %v356_v16 = vlaneseq (!%p187_p3) }
   0x9   : > { %s1360_s21 = smov (%p29_p4, %s1358_s21), 0  ;;  %190 = sbr.rel (%p187_p3) target bundleno = 507 (0x1fb), region = 32 }
   0xa   : > { %1050 = vmatprep.mubr.msk.f32.mxu0 (!%p187_p3), %vm263_vm0, %v249_v0  ;;  %v251_v1 = vld [vmem:[%s1346_s2] sm:$0xff] (!%p187_p3)  ;;  %380 = vxpose.xlu1.b32.start [1/2] (short) (narrow) (!%p187_p3), %v249_v0, 8  ;;  %v252_v4 = vld [vmem:[%s1346_s2 + $0x8] sm:$0xff] (!%p187_p3)  ;;  %vm270_vm1 = vcmask (!%p187_p3), 1043456   ;;  %v1209_v6 = vmov (!%p187_p3), 0.0|0.0   ;;  %vm1210_vm2 = vmmov (!%p187_p3), 0  }
   0xb   : > { %1167 = vset.pattern.permute.xlu0 (!%p187_p3), %v1208_v2  ;;  %1104 = vmatprep.subr.bf16.mxu1 (!%p187_p3), %v1209_v6  ;;  %v1211_v7 = vmov (!%p187_p3), 0.0   ;;  %v357_v19 = vshrl.u32 (!%p187_p3), %v356_v16, 7  ;;  %vm412_vm3 = vcmask (!%p187_p3), 130048   ;;  %v1212_v42 = vmov (!%p187_p3), 1.0|1.0  }
   0xc   : > { %255 = vperm.xlu0 (!%p187_p3), %1167, %v251_v1   ;;  %1078 = vmatprep.mubr.msk.f32.mxu1 (!%p187_p3), %vm1210_vm2, %v1211_v7 }
   0xd   : > { %v358_v22 = vadd.s32 (!%p187_p3), 8, %v357_v19 }
   0xe   : > { %381 = vxpose.xlu1.b32.end [2/2] (short) (narrow) (!%p187_p3), %v250_v3, 8 }
  0x10   : > { %s1362_s16 = smov (!%p225_p5, %s1194_s16), 1  ;;  %s1364_s15 = smov (!%p227_p6, %s1190_s15), 1  ;;  %260 = vperm.xlu0 %1167, %v252_v4  }
  0x11   : > { %s1009_s26 = sshll.u32 %s1362_s16, 1 }
  0x12   : > { %s1281_s5 = sadd.s32 %s1009_s26, %s1364_s15 }
  0x13   : > { %s1010_s6 = sshll.u32 %s1281_s5, 2  ;;  %s247_s12 = scalar_lea.vmem %s1348_s4, %s1281_s5 }
  0x14   : > { %s232_s9 = scalar_lea.vmem %s1344_s0, %s1010_s6  ;;  %s240_s15 = scalar_lea.vmem %s1347_s3, %s1010_s6 }
  0x15   : > { %v248_v5 = vld [vmem:[%s232_s9] sm:$0xf] }
  0x16   : > { %1048 = vmatprep.subr.msk.mxu0 %vm270_vm1, %v248_v5 }
  0x17   : > { %1049 = vmatpush3.msk.msra.mxu0 %vm270_vm1, %v248_v5 }
  0x18   : > { %1051 = vmatmul.mubr.msk.f32.vlgmr.msra.gmra.mrb[0].mxu0 %vm263_vm0, %v250_v3  ;;  %1095 = vmatprep.subr.bf16.mxu0 %v1209_v6 }
  0x19   : > { %1057 = vmatprep.mubr.msk.f32.mxu0 %vm1210_vm2, %v1211_v7 }
  0x8a   : > { %v396_v23 = vpop.trf.xlu1 }
  0x8b   : > { %v256_v8 = vpop.permute.xlu0 %255  ;;  %v414_v25 = vsel %vm412_vm3, %v396_v23, 0 }
  0x8c   : > { %v483_v29 = vand.u32 4294901760, %v414_v25 }
  0x8e   : > { %v484_v32 = vsub.f32 %v414_v25, %v483_v29 }
  0x8f   : > { %v261_v9 = vpop.permute.xlu0 %260 }
  0x90   : > { %v485_v35 = vand.u32 4294901760, %v484_v32 }
  0x92   : > { %v486_v38 = vsub.f32 %v484_v32, %v485_v35 }
  0x94   : > { %v487_v45 = vand.u32 4294901760, %v486_v38 }
  0xeb   : > { %v1052_v10 = vpop.f32.mrb[0].mxu0 }
  0xec   : > { %v346_v11 = vadd.f32 %v1052_v10, %v261_v9  ;;  %v340_v12 = vpop.f32.mrb[1].mxu0 }
  0xed   : > { %v341_v13 = vadd.f32 %v340_v12, %v256_v8 }
  0xef   : > { %v349_v14 = vmax.f32 %v341_v13, %v346_v11 }
  0xf1   : > { %v350_v15 = vrot.slane %v349_v14, 4 }
  0xf3   : > { %v351_v17 = vmax.f32 %v349_v14, %v350_v15 }
  0xf5   : > { %v352_v18 = vrot.slane %v351_v17, 2 }
  0xf7   : > { %v353_v20 = vmax.f32 %v351_v17, %v352_v18 }
  0xf9   : > { %v354_v21 = vrot.slane %v353_v20, 1 }
  0xfb   : > { %v355_v24 = vmax.f32 %v353_v20, %v354_v21 }
  0xfd   : > { %vm359_vm4 = vcmp.eq.f32.partialorder %v341_v13, %v355_v24  ;;  %vm360_vm5 = vcmp.eq.f32.partialorder %v346_v11, %v355_v24 }
  0xfe   : > { %v361_v26 = vsel %vm359_vm4, %v357_v19, 16  ;;  %v362_v27 = vsel %vm360_vm5, %v358_v22, 16 }
  0xff   : > { %vm363_vm6 = vcmp.lt.s32.totalorder %v361_v26, %v362_v27 }
 0x100   : > { %v364_v28 = vsel %vm363_vm6, %v361_v26, %v362_v27 }
 0x101   : > { %v365_v30 = vrot.slane %v364_v28, 4 }
 0x103   : > { %vm366_vm7 = vcmp.lt.s32.totalorder %v364_v28, %v365_v30 }
 0x104   : > { %v367_v31 = vsel %vm366_vm7, %v364_v28, %v365_v30 }
 0x105   : > { %v368_v33 = vrot.slane %v367_v31, 2 }
 0x107   : > { %vm369_vm8 = vcmp.lt.s32.totalorder %v367_v31, %v368_v33 }
 0x108   : > { %v370_v34 = vsel %vm369_vm8, %v367_v31, %v368_v33 }
 0x109   : > { %v371_v36 = vrot.slane %v370_v34, 1 }
 0x10b   : > { %vm372_vm9 = vcmp.lt.s32.totalorder %v370_v34, %v371_v36 }
 0x10c   : > { %v373_v37 = vsel %vm372_vm9, %v370_v34, %v371_v36 }
 0x10d   : > { %vm374_vm10 = vcmp.eq.s32.totalorder %v357_v19, %v373_v37  ;;  %vm375_vm11 = vcmp.eq.s32.totalorder %v358_v22, %v373_v37  ;;  %876 = vst [vmem:[%s247_s12] sm:$0x1] %v373_v37 }
 0x10e   : > { %v1017_v39 = vsel %vm374_vm10, 1.0, %v1211_v7  ;;  %v1018_v40 = vsel %vm375_vm11, 1.0, %v1211_v7  ;;  %vm1302_vm12 = vmpackc.low %vm375_vm11, %vm374_vm10 }
 0x10f   : > { %1097 = vmatpush3.bf16.msk.msra.mxu0 %vm1302_vm12, %v1212_v42  ;;  %v495_v43 = vsub.f32 %v1017_v39, %v1017_v39  ;;  %v502_v44 = vsub.f32 %v1018_v40, %v1018_v40  ;;  %1106 = vmatpush3.bf16.msk.msra.mxu1 %vm1302_vm12, %v1212_v42 }
 0x110   : > { %1107 = vmatprep.subr.bf16.mxu1 %v1209_v6  ;;  %1098 = vmatprep.subr.bf16.mxu0 %v1209_v6 }
 0x111   : > { %v496_v46 = vand.u32 4294901760, %v495_v43  ;;  %v503_v47 = vand.u32 4294901760, %v502_v44  ;;  %v1102_v54 = vpack.c.bf16 %v502_v44, %v495_v43 }
 0x112   : > { %1079 = vmatmul.mubr.f32.vlgmr.msra.gmra.mrb[0].mxu1 %v485_v35  ;;  %1058 = vmatmul.mubr.f32.vlgmr.msra.gmra.mrb[2].mxu0 %v487_v45 }
 0x113   : > { %v1108_v48 = vpack.c.bf16 %v503_v47, %v496_v46  ;;  %v497_v49 = vsub.f32 %v495_v43, %v496_v46  ;;  %v504_v50 = vsub.f32 %v502_v44, %v503_v47  ;;  %1085 = vmatprep.mubr.msk.f32.mxu1 %vm1210_vm2, %v1211_v7  ;;  %1064 = vmatprep.mubr.msk.f32.mxu0 %vm1210_vm2, %v1211_v7 }
 0x115   : > { %1109 = vmatpush3.bf16.msra.mxu1 %v1108_v48  ;;  %v498_v51 = vand.u32 4294901760, %v497_v49  ;;  %v505_v52 = vand.u32 4294901760, %v504_v50 }
 0x116   : > { %1110 = vmatprep.subr.bf16.mxu1 %v1209_v6 }
 0x117   : > { %v1099_v53 = vpack.c.bf16 %v505_v52, %v498_v51 }
 0x119   : > { %1100 = vmatpush3.bf16.msra.mxu0 %v1099_v53 }
 0x11a   : > { %1086 = vmatmul.mubr.f32.vlgmr.msra.gmra.mrb[0].mxu1 %v483_v29  ;;  %1101 = vmatprep.subr.bf16.mxu0 %v1209_v6 }
 0x11b   : > { %1112 = vmatpush3.bf16.msk.msra.mxu1 %vm1302_vm12, %v1212_v42  ;;  %1092 = vmatprep.mubr.msk.f32.mxu1 %vm1210_vm2, %v1211_v7 }
 0x11c   : > { %1065 = vmatmul.mubr.f32.vlgmr.msra.gmra.mrb[2].mxu0 %v483_v29 }
 0x11d   : > { %1103 = vmatpush3.bf16.msra.mxu0 %v1102_v54  ;;  %1071 = vmatprep.mubr.msk.f32.mxu0 %vm1210_vm2, %v1211_v7 }
 0x122   : > { %1093 = vmatmul.mubr.f32.vlgmr.msra.gmra.mrb[0].mxu1 %v483_v29 }
 0x124   : > { %1072 = vmatmul.mubr.f32.vlgmr.msra.gmra.mrb[2].mxu0 %v484_v32 }
 0x1f5   : > { %v871_v55 = vpop.f32.mrb[0].mxu1 }
 0x1f6   : > { %v1094_v56 = vpop.f32.mrb[1].mxu1 }
 0x1f7   : > { %v646_v57 = vpop.f32.mrb[2].mxu0 }
 0x1f8   : > { %v1113_v58 = vadd.f32 %v871_v55, %v646_v57  ;;  %v1073_v59 = vpop.f32.mrb[3].mxu0 }
 0x1fa   : > { %875 = vst [vmem:[%s240_s15] sm:$0xf] %v1113_v58 }
 0x1fb PF: > { %s15_s19 = sadd.s32 1, %s1206_s19   ;;  %s1351_s15 = smov %s1198_s17 }
 0x1fc   : > { %p12_p7 = scmp.ge.s32.totalorder %s15_s19, 6   ;;  %s1352_s16 = smov %s1202_s18 }
 0x1fd   : > { %s1353_s17 = smov %s1356_s20  ;;  %s1354_s18 = smov %s1360_s21 }
 0x1fe   :  { %14 = sbr.rel (!%p12_p7) target bundleno = 3 (0x3), region = 74 }

</bundles_post_ra>
